<compile_context>
chip_gen: v6e
topology: v6e:2x2x1
jax: 0.10.0
libtpu: 0.0.40
codegen_flags: <defaults>
</compile_context>

<pallas_src>
import functools

import jax
import jax.numpy as jnp
from jax.experimental import pallas as pl
from jax.experimental.pallas import tpu as pltpu


def _round_up(x, m):
    return (x + m - 1) // m * m


def _vmem_budget_bytes():
    """Generation-aware scoped-VMEM budget (bytes)."""
    try:
        phys = int(pltpu.get_tpu_info().vmem_capacity_bytes)
    except Exception:
        phys = 64 * 1024 * 1024          # conservative fallback (v7x per-TC)
    if phys >= 96 * 1024 * 1024:         # v5e / v6e: 128 MiB physical
        return 96 * 1024 * 1024
    return 44 * 1024 * 1024              # v7x: 64 MiB physical per TensorCore


def _choose_tiles(N, Dp_pad, E_pad, in_sz, out_sz, budget):
    """Pick (TN, TE).  Priority: TE = E_pad (weight stays VMEM-resident for the
    whole (n, b) sweep), then TN = round_up(N, 8) (one tile per batch element)."""
    usable = int(budget * 0.75)          # headroom for Mosaic internal scratch

    def footprint(tn, te):
        # double-buffered patches + weight (compute dtype), pos (f32), output.
        return 2 * (tn * Dp_pad * in_sz + Dp_pad * te * in_sz
                    + tn * te * 4 + tn * te * out_sz)

    # Descending multiples of 128 that divide E_pad (128 always qualifies).
    te_candidates = [d for d in range(E_pad, 127, -128) if E_pad % d == 0]
    tn_full = _round_up(N, 8)
    for te in te_candidates:
        tn = tn_full
        while tn > 8 and footprint(tn, te) > usable:
            tn = max(8, _round_up(tn // 2, 8))
        if footprint(tn, te) <= usable:
            return tn, te
    return 8, 128


def _patch_embed_kernel(patches_ref, w_ref, pos_ref, out_ref):
    # patches_ref: (TN, Dp_pad)  one batch element's tile of flattened patches
    # w_ref:       (Dp_pad, TE)  conv weight as a matmul matrix (E tiled)
    # pos_ref:     (TN, TE)      positional embedding + conv bias (f32)
    # out_ref:     (TN, TE)
    acc = jnp.dot(patches_ref[...], w_ref[...],
                  preferred_element_type=jnp.float32)       # MXU, f32 accumulate
    out_ref[...] = (acc + pos_ref[...]).astype(out_ref.dtype)


@functools.partial(jax.jit, static_argnames=("patch_size", "compute_dtype"))
def patch_embedding(x, conv_w, conv_b, pos_embed, *, patch_size,
                    compute_dtype=jnp.bfloat16):
    """x: (B, C, H, W) NCHW. conv_w: (E, C, P, P). conv_b: (E,). pos: (1, N, E)."""
    B, C, H, W = x.shape
    P = patch_size
    assert H % P == 0 and W % P == 0, "Image size must be divisible by patch size"
    E = conv_w.shape[0]
    Hp, Wp = H // P, W // P
    N = Hp * Wp
    Dp = C * P * P

    out_dtype = x.dtype
    in_sz = jnp.dtype(compute_dtype).itemsize
    out_sz = jnp.dtype(out_dtype).itemsize

    # Lane-dense embed dim; lane-aligned K when it is worth the padding.
    E_pad = _round_up(max(E, 128), 128)
    Dp_pad = _round_up(Dp, 128) if Dp > 128 else Dp

    budget = _vmem_budget_bytes()
    TN, TE = _choose_tiles(N, Dp_pad, E_pad, in_sz, out_sz, budget)
    n_tiles = pl.cdiv(N, TN)
    N_pad = n_tiles * TN
    e_tiles = E_pad // TE

    # --- im2col: (B, C, H, W) -> (B, N_pad, Dp_pad), features in (c, i, j)
    # order to match the Conv2d weight layout.  Materialized by XLA as one
    # contiguous pass (strided NCHW gathers are NOT fused into the kernel DMA).
    patches = x.reshape(B, C, Hp, P, Wp, P).transpose(0, 2, 4, 1, 3, 5)
    patches = patches.reshape(B, N, Dp)
    if (N_pad, Dp_pad) != (N, Dp):
        patches = jnp.pad(patches, ((0, 0), (0, N_pad - N), (0, Dp_pad - Dp)))
    patches = patches.astype(compute_dtype)

    w_mat = conv_w.reshape(E, Dp).T                          # (Dp, E)
    if (Dp_pad, E_pad) != (Dp, E):
        w_mat = jnp.pad(w_mat, ((0, Dp_pad - Dp), (0, E_pad - E)))
    w_mat = w_mat.astype(compute_dtype)

    # Fold the conv bias into the positional embedding -> single epilogue add.
    pos_b = (pos_embed.reshape(N, E).astype(jnp.float32)
             + conv_b.astype(jnp.float32)[None, :])
    if (N_pad, E_pad) != (N, E):
        pos_b = jnp.pad(pos_b, ((0, N_pad - N), (0, E_pad - E)))

    # Grid order (e, n, b): e OUTER -> weight block resident across the whole
    # (n, b) sweep; b innermost -> streams patches / output tiles.
    grid = (e_tiles, n_tiles, B)

    out = pl.pallas_call(
        _patch_embed_kernel,
        out_shape=jax.ShapeDtypeStruct((B, N_pad, E_pad), out_dtype),
        grid_spec=pltpu.PrefetchScalarGridSpec(
            num_scalar_prefetch=0,
            grid=grid,
            in_specs=[
                pl.BlockSpec((None, TN, Dp_pad), lambda e, n, b: (b, n, 0)),
                pl.BlockSpec((Dp_pad, TE),       lambda e, n, b: (0, e)),
                pl.BlockSpec((TN, TE),           lambda e, n, b: (n, e)),
            ],
            out_specs=pl.BlockSpec((None, TN, TE), lambda e, n, b: (b, n, e)),
        ),
        compiler_params=pltpu.CompilerParams(
            dimension_semantics=("parallel", "parallel", "parallel"),
            vmem_limit_bytes=int(budget),
        ),
    )(patches, w_mat, pos_b)

    return out[:, :N, :E]


def _reference(x, conv_w, conv_b, pos_embed, patch_size):
    """Plain-JAX reference matching the PyTorch forward."""
    B, C, H, W = x.shape
    P = patch_size
    E = conv_w.shape[0]
    Hp, Wp = H // P, W // P
    patches = x.reshape(B, C, Hp, P, Wp, P).transpose(0, 2, 4, 1, 3, 5)
    patches = patches.reshape(B, Hp * Wp, C * P * P)
    out = jnp.einsum("bnd,ed->bne", patches, conv_w.reshape(E, -1)) + conv_b
    return out + pos_embed


if __name__ == "__main__":
    def run_case(case_idx, batch, in_channels, img_size, patch_size, embed_dim):
        num_patches = (img_size // patch_size) ** 2
        key = jax.random.fold_in(jax.random.PRNGKey(0), case_idx)
        k_x, k_w, k_b, k_pos = jax.random.split(key, 4)

        x = jax.random.normal(k_x, (batch, in_channels, img_size, img_size),
                              jnp.float32)
        conv_w = 0.02 * jax.random.normal(
            k_w, (embed_dim, in_channels, patch_size, patch_size), jnp.float32)
        conv_b = 0.02 * jax.random.normal(k_b, (embed_dim,), jnp.float32)
        pos_embed = 0.02 * jax.random.truncated_normal(
            k_pos, -2.0, 2.0, (1, num_patches, embed_dim), jnp.float32)

        ref = _reference(x, conv_w, conv_b, pos_embed, patch_size)

        # Bit-faithful f32 path (matches PyTorch semantics).
        out_f32 = patch_embedding(x, conv_w, conv_b, pos_embed,
                                  patch_size=patch_size,
                                  compute_dtype=jnp.float32)
        out_f32 = jax.block_until_ready(out_f32)
        assert out_f32.shape == (batch, num_patches, embed_dim), out_f32.shape
        assert jnp.allclose(out_f32, ref, atol=1e-5, rtol=1e-5), "f32 mismatch"

        # bf16-input / f32-accumulate path (perf default on v6e/v7x).
        out_bf16 = patch_embedding(x, conv_w, conv_b, pos_embed,
                                   patch_size=patch_size,
                                   compute_dtype=jnp.bfloat16)
        out_bf16 = jax.block_until_ready(out_bf16)
        assert out_bf16.shape == (batch, num_patches, embed_dim), out_bf16.shape
        assert jnp.allclose(out_bf16, ref, atol=1e-2, rtol=1e-2), "bf16 mismatch"

    # Small config consistent with the module: img 16, patch 4, C=4, E=32
    #   -> N=16, Dp=64 (grid (1, 1, 2), fully aligned).
    run_case(0, batch=2, in_channels=4, img_size=16, patch_size=4, embed_dim=32)
    # Non-8-aligned patch count (N=49 -> N_pad=56) exercises the row padding /
    # masked-store path flagged in the review.
    run_case(1, batch=2, in_channels=3, img_size=28, patch_size=4, embed_dim=48)

    print("KERNEL_OK")
</pallas_src>

<mosaic_0001>
module attributes {stable_mosaic.version = 11 : i64} {
  func.func @_patch_embed_kernel(%arg0: i32, %arg1: i32, %arg2: i32, %arg3: memref<1x16x64xf32, #tpu.memory_space<vmem>>, %arg4: memref<64x128xf32, #tpu.memory_space<vmem>>, %arg5: memref<16x128xf32, #tpu.memory_space<vmem>>, %arg6: memref<1x16x128xf32, #tpu.memory_space<vmem>>) attributes {dimension_semantics = [#tpu.dimension_semantics<parallel>, #tpu.dimension_semantics<parallel>, #tpu.dimension_semantics<parallel>], iteration_bounds = array<i64: 1, 1, 2>, scalar_prefetch = 0 : i64, scratch_operands = 0 : i64, tpu.core_type = #tpu.core_type<tc>, window_params = [{transform_indices = @transform_0, window_bounds = array<i64: 1, 16, 64>}, {transform_indices = @transform_1, window_bounds = array<i64: 64, 128>}, {transform_indices = @transform_2, window_bounds = array<i64: 16, 128>}, {transform_indices = @transform_3, window_bounds = array<i64: 1, 16, 128>}]} {
    %c0 = arith.constant 0 : index
    %c0_0 = arith.constant 0 : index
    %c0_1 = arith.constant 0 : index
    %0 = vector.load %arg3[%c0, %c0_0, %c0_1] : memref<1x16x64xf32, #tpu.memory_space<vmem>>, vector<1x16x64xf32>
    %1 = vector.shape_cast %0 : vector<1x16x64xf32> to vector<16x64xf32>
    %c0_2 = arith.constant 0 : index
    %c0_3 = arith.constant 0 : index
    %2 = vector.load %arg4[%c0_2, %c0_3] : memref<64x128xf32, #tpu.memory_space<vmem>>, vector<64x128xf32>
    %cst = arith.constant dense<0.000000e+00> : vector<16x128xf32>
    %3 = tpu.matmul %1, %2, %cst {dimension_numbers = #tpu.dot_dimension_numbers<[1], [0], [0], [1], [0, 0, 1, 1], [], []>} : vector<16x64xf32>, vector<64x128xf32>, vector<16x128xf32> -> vector<16x128xf32>
    %c0_4 = arith.constant 0 : index
    %c0_5 = arith.constant 0 : index
    %4 = vector.load %arg5[%c0_4, %c0_5] : memref<16x128xf32, #tpu.memory_space<vmem>>, vector<16x128xf32>
    %5 = arith.addf %3, %4 : vector<16x128xf32>
    %c0_6 = arith.constant 0 : index
    %c0_7 = arith.constant 0 : index
    %c0_8 = arith.constant 0 : index
    %6 = vector.load %arg6[%c0_6, %c0_7, %c0_8] : memref<1x16x128xf32, #tpu.memory_space<vmem>>, vector<1x16x128xf32>
    %7 = vector.shape_cast %6 : vector<1x16x128xf32> to vector<16x128xf32>
    %8 = vector.shape_cast %5 : vector<16x128xf32> to vector<1x16x128xf32>
    tpu.vector_store %arg6[%c0_6, %c0_7, %c0_8], %8 {strides = array<i32>} : memref<1x16x128xf32, #tpu.memory_space<vmem>>, vector<1x16x128xf32>,
    return
  }
  func.func @transform_0(%arg0: i32, %arg1: i32, %arg2: i32) -> (i32, i32, i32) {
    %c0_i32 = arith.constant 0 : i32
    %c0_i32_0 = arith.constant 0 : i32
    return %arg2, %arg1, %c0_i32 : i32, i32, i32
  }
  func.func @transform_1(%arg0: i32, %arg1: i32, %arg2: i32) -> (i32, i32) {
    %c0_i32 = arith.constant 0 : i32
    %c0_i32_0 = arith.constant 0 : i32
    return %c0_i32, %arg0 : i32, i32
  }
  func.func @transform_2(%arg0: i32, %arg1: i32, %arg2: i32) -> (i32, i32) {
    %c0_i32 = arith.constant 0 : i32
    return %arg1, %arg0 : i32, i32
  }
  func.func @transform_3(%arg0: i32, %arg1: i32, %arg2: i32) -> (i32, i32, i32) {
    %c0_i32 = arith.constant 0 : i32
    return %arg2, %arg1, %arg0 : i32, i32, i32
  }
}

</mosaic_0001>

<bundles_post_ra>
// kernel: patch_embedding.1
= control target key start
LH: loop header
LB: loop body
LE: loop exit
PB: predicated region body
PF: predicated region fallthrough
CT: control target
= control target key end

     0   :  { %8 = vsyncpa [#allocation3], 0  ;;  %s840_s0 = inlined_call_operand.vmem [shape: f32[2,16,64], index: 0, kind: input, shape index: {}]   ;;  %s841_s1 = inlined_call_operand.vmem [shape: f32[64,128], index: 1, kind: input, shape index: {}]   ;;  %s842_s2 = inlined_call_operand.vmem [shape: f32[16,128], index: 2, kind: input, shape index: {}]   ;;  %s843_s3 = inlined_call_operand.hbm [shape: f32[2,16,128], index: 3, kind: output, shape index: {}]  }
   0x1   :  { %10 = vsyncpa [#allocation3 + $0x1], 0  ;;  %s694_s12 = smov 0   ;;  %s696_s13 = smov 0  }
   0x2   :  { %s698_s14 = smov 0   ;;  %s700_s15 = smov 0  }
   0x3   :  { %s702_s16 = smov 0   ;;  %s704_s17 = smov 0  }
   0x4 LB: > { %s488_s18 = sadd.s32 4294967295, %s669_s17   ;;  %s489_s19 = sadd.s32 4294967294, %s669_s17   ;;  %s669_s17 = sphi %s704_s17, %s16_s17   ;;  %s665_s16 = sphi %s702_s16, %s850_s16   ;;  %s661_s15 = sphi %s700_s15, %s849_s15   ;;  %s657_s14 = sphi %s698_s14, %s848_s14   ;;  %s653_s13 = sphi %s696_s13, %s847_s13   ;;  %s649_s12 = sphi %s694_s12, %s846_s12  }
   0x5   : > { %s28_s20 = sadd.s32 1, %s665_s16  ;;  %s128_s21 = sadd.s32 1, %s657_s14 }
   0x6   : > { %p29_p0 = scmp.ge.s32.totalorder %s28_s20, 2  ;;  %p138_p1 = scmp.ne.s32.totalorder %s657_s14, %s653_s13 }
   0x7   : > { %p139_p2 = scmp.eq.s32.totalorder %s488_s18, 1  ;;  %p144_p3 = scmp.ne.s32.totalorder %s653_s13, %s649_s12 }
   0x8   : > { %s852_s20 = smov (%p29_p0, %s28_s20), 0  ;;  %p145_p5 = scmp.eq.s32.totalorder %s489_s19, 1 }
   0x9   : > { %p734_p4 = por %p139_p2, %p138_p1  ;;  %s121_s23 = ssub.s32 %s665_s16, %s852_s20 }
   0xa   : > { %p494_p6 = scmp.ge.s32.totalorder %s669_s17, 1  ;;  %p126_p7 = scmp.eq.s32.totalorder %s121_s23, 0 }
   0xb   : > { %p741_p8 = por %p145_p5, %p144_p3  ;;  %p195_p9 = scmp.lt.s32.totalorder %s669_s17, 3 }
   0xc   : > { %s747_s25 = scalar_select %p126_p7, %s657_s14, %s128_s21  }
   0xd   : > { %p196_p10 = pnand %p494_p6, %p195_p9 }
   0xe   : > { %p236_p11 = scmp.lt.s32.totalorder (!%p196_p10), %s661_s15, 1  ;;  %s232_s30 = sand.u32 (!%p196_p10), 1, %s653_s13  }
   0xf   : > { %199 = sbr.rel (%p196_p10) target bundleno = 248 (0xf8), region = 32  ;;  %s495_s4 = sshll.u32 (!%p196_p10), %s232_s30, 4 }
  0x10   : > { %s234_s7 = scalar_lea.vmem (!%p196_p10), [#allocation2], %s495_s4  ;;  %s506_s9 = sshll.u32 (!%p196_p10), %s661_s15, 8 }
  0x11   : > { %s793_s21 = scalar_lea.hbm (!%p196_p10), %s843_s3, %s506_s9  ;;  %s671_s26 = smov (!%p196_p10), [#allocation2]  }
  0x12   : > { %s597_s27 = sshll.u32 (!%p196_p10), %s671_s26, 4  ;;  %s598_s27 = int_to_ptr.vmem [resolvable:$false] %s597_s27 }
  0x13   : > { %s599_s28 = scalar_lea.vmem (!%p196_p10), %s598_s27, 512 }
  0x14   : > { %v268_v0 = vld [vmem:[%s841_s1 + $0x38] sm:$0xff]  ;;  %v267_v1 = vld [vmem:[%s841_s1 + $0x30] sm:$0xff]  ;;  %v266_v2 = vld [vmem:[%s841_s1 + $0x28] sm:$0xff]  ;;  %s237_s5 = scalar_select %p236_p11, %s661_s15, 1  ;;  %vm271_vm0 = vcmask 523264  }
  0x15   : > { %517 = vmatprep.subr.mxu0 %v268_v0  ;;  %v265_v3 = vld [vmem:[%s841_s1 + $0x20] sm:$0xff]  ;;  %v264_v4 = vld [vmem:[%s841_s1 + $0x18] sm:$0xff]  ;;  %v263_v6 = vld [vmem:[%s841_s1 + $0x10] sm:$0xff]  ;;  %s795_s15 = scalar_lea.sflag [#allocation3], %s232_s30 }
  0x16   : > { %518 = vmatpush3.msra.mxu0 %v268_v0  ;;  %s505_s8 = sshll.u32 %s237_s5, 4  ;;  %v262_v7 = vld [vmem:[%s841_s1 + $0x8] sm:$0xff]  ;;  %v261_v8 = vld [vmem:[%s841_s1] sm:$0xff] }
  0x17   : > { %519 = vmatprep.subr.mxu0 %v267_v1  ;;  %s243_s11 = scalar_lea.vmem %s840_s0, %s505_s8  ;;  %v270_v10 = vld [vmem:[%s842_s2 + $0x8] sm:$0xff]  ;;  %s372_s8 = sshll.u32 %s234_s7, 4  ;;  %v269_v12 = vld [vmem:[%s842_s2] sm:$0xff]  ;;  %s788_s8 = int_to_ptr.vmem [resolvable:$true] %s372_s8 }
  0x18   : > { %520 = vmatpush3.msra.mxu0 %v267_v1  ;;  %v259_v5 = vld [vmem:[%s243_s11] sm:$0xff]  ;;  %v260_v9 = vld [vmem:[%s243_s11 + $0x8] sm:$0xff]  ;;  %s593_s23 = scalar_lea.vmem %s788_s8, 256  ;;  %p600_p1 = scmp.lt.s32.totalorder %s788_s8, %s598_s27 }
  0x19   : > { %521 = vmatprep.subr.mxu0 %v266_v2  ;;  %533 = vmatprep.mubr.msk.f32.mxu0 %vm271_vm0, %v259_v5  ;;  %p594_p12 = scmp.ne.s32.totalorder %s788_s8, %s593_s23  ;;  %p601_p2 = scmp.lt.s32.totalorder %s599_s28, %s593_s23 }
  0x1a   : > { %522 = vmatpush3.msra.mxu0 %v266_v2 }
  0x1b   : > { %523 = vmatprep.subr.mxu0 %v265_v3  ;;  %p595_p13 = pnand %p594_p12, %p734_p4  ;;  %p602_p3 = por %p601_p2, %p600_p1 }
  0x1c   : > { %524 = vmatpush3.msra.mxu0 %v265_v3 }
  0x1d   : > { %525 = vmatprep.subr.mxu0 %v264_v4  ;;  %p596_p0 = pneg %p595_p13 }
  0x1e   : > { %526 = vmatpush3.msra.mxu0 %v264_v4 }
  0x1f   : > { %527 = vmatprep.subr.mxu0 %v263_v6  ;;  %p603_p5 = pnand %p602_p3, %p596_p0 }
  0x20   : > { %528 = vmatpush3.msra.mxu0 %v263_v6 }
  0x21   : > { %529 = vmatprep.subr.mxu0 %v262_v7 }
  0x22   : > { %530 = vmatpush3.msra.mxu0 %v262_v7 }
  0x23   : > { %531 = vmatprep.subr.mxu0 %v261_v8 }
  0x24   : > { %532 = vmatpush3.msra.mxu0 %v261_v8 }
  0x25   : > { %534 = vmatmul.mubr.msk.f32.vlgmr.msra.gmra.mxu0 %vm271_vm0, %v260_v9 }
  0xe5   : > { %v535_v11 = vpop.f32.mrf.mxu0 }
  0xe6   : > { %v350_v13 = vadd.f32 %v535_v11, %v270_v10 }
  0xe7   : > { %v344_v14 = vpop.f32.mrf.mxu0 }
  0xe8   : > { %354 = vst [vmem:[%s234_s7 + $0x8] sm:$0xff] %v350_v13  ;;  %v345_v15 = vadd.f32 %v344_v14, %v269_v12 }
  0xea   : > { %353 = vst [vmem:[%s234_s7] sm:$0xff] %v345_v15 }
  0xeb   : > { %606 = shalt.err (!%p603_p5)
}
  0xec   : > { %s607_s29 = scalar_lea.hbm %s793_s21, 256  ;;  %s611_s5 = scalar_lea.hbm %s843_s3, 512 }
  0xed   : > { %p608_p6 = scmp.ne.s32.totalorder %s793_s21, %s607_s29  ;;  %p612_p10 = scmp.lt.s32.totalorder %s793_s21, %s843_s3 }
  0xee   : > { %p613_p11 = scmp.lt.s32.totalorder %s611_s5, %s607_s29 }
  0xef   : > { %p609_p7 = pnand %p608_p6, %p734_p4 }
  0xf0   : > { %p614_p12 = por %p613_p11, %p612_p10 }
  0xf1   : > { %p610_p9 = pneg %p609_p7 }
  0xf3   : > { %p615_p13 = pnand %p614_p12, %p610_p9 }
  0xf5   : > { %618 = shalt.err (!%p615_p13)
}
  0xf6   : > { %s672_s9 = smov 128   ;;  %s673_s10 = smov 8  }
  0xf7   : > { %536 = dma.vmem_to_hbm [thread:$0]  (%p734_p4), %s788_s8, 256, %s793_s21, %s795_s15, %s672_s9, %s672_s9, %s673_s10  }
  0xf8 PF: > { %p542_p0 = scmp.ge.s32.totalorder %s669_s17, 2  ;;  %s387_s18 = sand.u32 1, %s649_s12  }
  0xf9   : > { %s388_s11 = scalar_lea.sflag [#allocation3], %s387_s18 }
  0xfa   : > { %p539_p1 = pnand %p542_p0, %p741_p8 }
  0xfc   : > { %p540_p2 = pneg %p539_p1 }
  0xfe   : > { %644 = dma.done.wait (%p540_p2), %s388_s11, 256  }
  0xff   : > { %646 = vsyncadd (%p540_p2), %s388_s11, 4294967040  ;;  %s16_s17 = sadd.s32 1, %s669_s17   ;;  %s846_s12 = smov %s653_s13 }
 0x100   : > { %p13_p3 = scmp.ge.s32.totalorder %s16_s17, 4   ;;  %s847_s13 = smov %s657_s14 }
 0x101   : > { %s848_s14 = smov %s747_s25  ;;  %s849_s15 = smov %s665_s16 }
 0x102   : > { %s850_s16 = smov %s852_s20  ;;  %15 = sbr.rel (!%p13_p3) target bundleno = 4 (0x4), region = 73 }
 0x107   :  { %393 = vsyncpa [#allocation3], 1 }
 0x108   :  { %395 = vsyncpa [#allocation3 + $0x1], 1 }

</bundles_post_ra>
